<compile_context>
chip_gen: v5e
topology: v5e:2x2
jax: 0.10.0
libtpu: 0.0.40
codegen_flags: <defaults>
</compile_context>

<pallas_src>
import functools

import jax
import jax.numpy as jnp
from jax.experimental import pallas as pl
from jax.experimental.pallas import tpu as pltpu


def _round_up(n, m):
    return ((n + m - 1) // m) * m


def _mish_fast(a):
    # mish(x) = x * tanh(softplus(x)) = x * u / (u + 2), u = t*(t+2), t = exp(x).
    # Single EUP exp + approx EUP reciprocal; passthrough for a > 20 (PyTorch softplus
    # threshold) keeps exp from overflowing and matches the reference asymptote.
    t = jnp.exp(jnp.minimum(a, 20.0))
    u = t * (t + 2.0)
    return jnp.where(a > 20.0, a, a * u * pl.reciprocal(u + 2.0, approx=True))


def _ff_kernel(x_ref, gin_ref, w1v_ref, w1g_ref, w2_ref, gout_ref, o_ref,
               xn_ref, acc_ref, *, eps, inv_d, mxu_dtype):
    h = pl.program_id(1)

    @pl.when(h == 0)
    def _():
        # RMSNorm (input) in f32. Padded lanes of x / gamma are zero, so summing over
        # the padded lane axis and dividing by the true D is exact.
        x = x_ref[...].astype(jnp.float32)
        ssq = jnp.sum(x * x, axis=-1, keepdims=True)
        xn = x * jax.lax.rsqrt(ssq * inv_d + eps) * gin_ref[...].astype(jnp.float32)
        xn_ref[...] = xn.astype(mxu_dtype)
        acc_ref[...] = jnp.zeros_like(acc_ref)

    # First projection (value / gate halves): bf16 operands, f32 accumulation.
    xm = xn_ref[...]
    val = jnp.dot(xm, w1v_ref[...], preferred_element_type=jnp.float32)
    gate = jnp.dot(xm, w1g_ref[...], preferred_element_type=jnp.float32)

    hid = _mish_fast(val) * gate          # drop1: identity in eval mode
    acc_ref[...] += jnp.dot(hid.astype(mxu_dtype), w2_ref[...],
                            preferred_element_type=jnp.float32)

    @pl.when(h == pl.num_programs(1) - 1)
    def _():
        # RMSNorm (output) in f32; drop2 is identity in eval mode.
        y = acc_ref[...]
        ssq = jnp.sum(y * y, axis=-1, keepdims=True)
        out = y * jax.lax.rsqrt(ssq * inv_d + eps) * gout_ref[...].astype(jnp.float32)
        o_ref[...] = out.astype(o_ref.dtype)


def _vmem_budget_bytes():
    # Generation-aware budget: physical VMEM minus ~16 MiB headroom for compiler
    # scratch (≈48 MiB on v7x, ≈112 MiB on v5e/v6e). Fall back to the v7x value.
    cap = 64 << 20
    try:
        info = pltpu.get_tpu_info()
        for name in ("vmem_capacity_bytes", "vmem_size_bytes"):
            v = getattr(info, name, None)
            if v:
                cap = int(v)
                break
    except Exception:
        pass
    return max(cap - (16 << 20), 32 << 20)


def _bspec(shape, index_map, *, single_buffer=False):
    if single_buffer:
        try:
            # Grid-invariant operand: keep a single VMEM copy instead of the default 2.
            return pl.BlockSpec(shape, index_map, pipeline_mode=pl.Buffered(1))
        except Exception:
            pass
    return pl.BlockSpec(shape, index_map)


def _vmem_bytes(tm, th, d_pad, h_resident, x_bytes, out_bytes, w_bytes):
    nbuf_w = 1 if th >= h_resident else 2
    return (
        2 * tm * d_pad * x_bytes                              # x tile (double-buffered)
        + 2 * tm * d_pad * out_bytes                          # out tile (double-buffered)
        + 2 * d_pad * 4                                       # gammas (single-buffered)
        + nbuf_w * (2 * d_pad * th + th * d_pad) * w_bytes    # W1v + W1g + W2 tiles
        + tm * d_pad * (2 + 4 + 4)                            # xn(bf16) + acc(f32) + dot2 f32
        + tm * th * (3 * 4 + 2 * 4 + 2)                       # val/gate/hid f32 + mish tmp + hid bf16
    )


def feed_forward(x, g_in, w1, w2, g_out, *, eps=1e-5, tm=None,
                 mxu_dtype=jnp.bfloat16):
    """x: (B, S, D). g_in/g_out: (D,). w1: (D, 2H). w2: (H, D). Eval-mode forward."""
    B, S, D = x.shape
    H = w2.shape[0]
    assert w1.shape == (D, 2 * H) and w2.shape == (H, D)

    M = B * S
    x_bytes = jnp.dtype(x.dtype).itemsize
    w_bytes = jnp.dtype(mxu_dtype).itemsize
    budget = _vmem_budget_bytes()

    # Lane/MXU-friendly padding of feature dims; row tile is a multiple of 16
    # regardless of x dtype (the MXU operands are bf16 -> 16 rows/sublane vreg).
    D_pad = _round_up(D, 128)
    H_pad = _round_up(H, 128)
    SUB = 16

    M_sub = _round_up(M, SUB)
    if tm is None:
        tm = 512 if budget > (96 << 20) else 256    # bigger row tiles when VMEM allows
    tm_eff = min(tm, M_sub)
    # Keep >= 2 grid steps along the parallel M axis when possible (v7x has 2 TCs).
    if M_sub >= 2 * SUB and M_sub // tm_eff < 2:
        tm_eff = _round_up(-(-M_sub // 2), SUB)

    # Hidden tile: keep all weights VMEM-resident if the honest estimate fits the
    # budget; otherwise tile H (weights then use default double-buffering), and only
    # then shrink the row tile.
    th = H_pad
    while _vmem_bytes(tm_eff, th, D_pad, H_pad, x_bytes, x_bytes, w_bytes) > budget and th > 128:
        th = max(128, _round_up(th // 2, 128))
    while _vmem_bytes(tm_eff, th, D_pad, H_pad, x_bytes, x_bytes, w_bytes) > budget and tm_eff > SUB:
        tm_eff = max(SUB, _round_up(tm_eff // 2, SUB))

    H_full = _round_up(H_pad, th)        # make the H grid exact (extra cols are zero)
    hsteps = H_full // th
    M_pad = _round_up(M, tm_eff)

    est = _vmem_bytes(tm_eff, th, D_pad, H_pad, x_bytes, x_bytes, w_bytes)
    vmem_limit = int(min(budget, max(est + (4 << 20), 32 << 20)))

    # Pack operands: tokens flattened/padded; W1 split into value / gate halves;
    # everything zero-padded and pre-cast to the MXU dtype.
    xf = jnp.pad(x.reshape(M, D), ((0, M_pad - M), (0, D_pad - D)))

    def pad2(a, r, c):
        return jnp.pad(a, ((0, r - a.shape[0]), (0, c - a.shape[1])))

    w1v = pad2(w1[:, :H], D_pad, H_full).astype(mxu_dtype)
    w1g = pad2(w1[:, H:], D_pad, H_full).astype(mxu_dtype)
    w2c = pad2(w2, H_full, D_pad).astype(mxu_dtype)
    gin2 = jnp.pad(g_in, (0, D_pad - D)).reshape(1, D_pad).astype(jnp.float32)
    gout2 = jnp.pad(g_out, (0, D_pad - D)).reshape(1, D_pad).astype(jnp.float32)

    kernel = functools.partial(_ff_kernel, eps=eps, inv_d=1.0 / D, mxu_dtype=mxu_dtype)
    w_single = hsteps == 1                # weights grid-invariant only if not H-tiled

    out = pl.pallas_call(
        kernel,
        out_shape=jax.ShapeDtypeStruct((M_pad, D_pad), x.dtype),
        grid_spec=pltpu.PrefetchScalarGridSpec(
            num_scalar_prefetch=0,
            grid=(M_pad // tm_eff, hsteps),
            in_specs=[
                _bspec((tm_eff, D_pad), lambda i, h: (i, 0)),                      # x tile
                _bspec((1, D_pad), lambda i, h: (0, 0), single_buffer=True),       # gamma_in
                _bspec((D_pad, th), lambda i, h: (0, h), single_buffer=w_single),  # W1 value
                _bspec((D_pad, th), lambda i, h: (0, h), single_buffer=w_single),  # W1 gate
                _bspec((th, D_pad), lambda i, h: (h, 0), single_buffer=w_single),  # W2
                _bspec((1, D_pad), lambda i, h: (0, 0), single_buffer=True),       # gamma_out
            ],
            out_specs=pl.BlockSpec((tm_eff, D_pad), lambda i, h: (i, 0)),
            scratch_shapes=[
                pltpu.VMEM((tm_eff, D_pad), mxu_dtype),     # normalized-x MXU operand
                pltpu.VMEM((tm_eff, D_pad), jnp.float32),   # y accumulator across H tiles
            ],
        ),
        compiler_params=pltpu.CompilerParams(
            dimension_semantics=("parallel", "arbitrary"),
            vmem_limit_bytes=vmem_limit,
        ),
    )(xf, gin2, w1v, w1g, w2c, gout2)

    return out[:M, :D].reshape(B, S, D)


def _reference(x, g_in, w1, w2, g_out, *, eps=1e-5, mxu_dtype=jnp.bfloat16):
    # Mirrors the kernel's mixed precision (bf16 matmul operands, f32 accumulation and
    # f32 RMSNorm/mish epilogue); mish uses the exact softplus/tanh definition.
    def rms(v, g):
        return v * jax.lax.rsqrt(jnp.mean(v * v, axis=-1, keepdims=True) + eps) * g

    def mish(a):
        sp = jnp.where(a > 20.0, a, jnp.log1p(jnp.exp(jnp.minimum(a, 20.0))))
        return a * jnp.tanh(sp)

    B, S, D = x.shape
    H = w2.shape[0]
    xf = x.reshape(-1, D).astype(jnp.float32)
    xn = rms(xf, g_in.astype(jnp.float32)).astype(mxu_dtype)
    val = jnp.dot(xn, w1[:, :H].astype(mxu_dtype), preferred_element_type=jnp.float32)
    gate = jnp.dot(xn, w1[:, H:].astype(mxu_dtype), preferred_element_type=jnp.float32)
    hid = (mish(val) * gate).astype(mxu_dtype)
    y = jnp.dot(hid, w2.astype(mxu_dtype), preferred_element_type=jnp.float32)
    out = rms(y, g_out.astype(jnp.float32))
    return out.astype(x.dtype).reshape(B, S, D)


if __name__ == "__main__":
    B, S, dim, ff_mult = 2, 8, 32, 2
    hidden = int(dim * ff_mult)

    key = jax.random.PRNGKey(0)
    kx, k1, k2 = jax.random.split(key, 3)

    x = jax.random.normal(kx, (B, S, dim), dtype=jnp.float32)

    # Deterministic synthetic parameters (nn.Linear-like init, stored as (in, out)).
    g_in = jnp.ones((dim,), dtype=jnp.float32)
    g_out = jnp.ones((dim,), dtype=jnp.float32)
    w1 = jax.random.uniform(k1, (dim, 2 * hidden), jnp.float32,
                            -1.0 / dim ** 0.5, 1.0 / dim ** 0.5)
    w2 = jax.random.uniform(k2, (hidden, dim), jnp.float32,
                            -1.0 / hidden ** 0.5, 1.0 / hidden ** 0.5)

    out = jax.block_until_ready(feed_forward(x, g_in, w1, w2, g_out))
    ref = _reference(x, g_in, w1, w2, g_out)

    assert out.shape == (B, S, dim)
    # Tolerance accounts for the approximate EUP reciprocal in the kernel's mish gate
    # on top of the shared bf16 matmul rounding.
    err = float(jnp.max(jnp.abs(out - ref)))
    assert err < 1e-2, err

    # TODO(synk): drop1/drop2 (nn.Dropout p=0.1) run in eval mode (identity); no RNG applied.
    print("KERNEL_OK")
</pallas_src>

<mosaic_0001>
module attributes {stable_mosaic.version = 11 : i64} {
  func.func @_ff_kernel(%arg0: i32, %arg1: i32, %arg2: memref<16x128xf32, #tpu.memory_space<vmem>>, %arg3: memref<1x128xf32, #tpu.memory_space<vmem>>, %arg4: memref<128x128xbf16, #tpu.memory_space<vmem>>, %arg5: memref<128x128xbf16, #tpu.memory_space<vmem>>, %arg6: memref<128x128xbf16, #tpu.memory_space<vmem>>, %arg7: memref<1x128xf32, #tpu.memory_space<vmem>>, %arg8: memref<16x128xf32, #tpu.memory_space<vmem>>, %arg9: memref<16x128xbf16, #tpu.memory_space<vmem>>, %arg10: memref<16x128xf32, #tpu.memory_space<vmem>>) attributes {dimension_semantics = [#tpu.dimension_semantics<parallel>, #tpu.dimension_semantics<arbitrary>], iteration_bounds = array<i64: 1, 1>, scalar_prefetch = 0 : i64, scratch_operands = 2 : i64, tpu.core_type = #tpu.core_type<tc>, window_params = [{transform_indices = @transform_0, window_bounds = array<i64: 16, 128>}, {pipeline_mode = #tpu.pipeline_mode<synchronous>, transform_indices = @transform_1, window_bounds = array<i64: 1, 128>}, {pipeline_mode = #tpu.pipeline_mode<synchronous>, transform_indices = @transform_2, window_bounds = array<i64: 128, 128>}, {pipeline_mode = #tpu.pipeline_mode<synchronous>, transform_indices = @transform_3, window_bounds = array<i64: 128, 128>}, {pipeline_mode = #tpu.pipeline_mode<synchronous>, transform_indices = @transform_4, window_bounds = array<i64: 128, 128>}, {pipeline_mode = #tpu.pipeline_mode<synchronous>, transform_indices = @transform_5, window_bounds = array<i64: 1, 128>}, {transform_indices = @transform_6, window_bounds = array<i64: 16, 128>}]} {
    %c0_i32 = arith.constant 0 : i32
    %0 = arith.cmpi eq, %arg1, %c0_i32 : i32
    %1 = arith.extui %0 : i1 to i32
    %c0_i32_0 = arith.constant 0 : i32
    %2 = arith.cmpi ne, %1, %c0_i32_0 : i32
    scf.if %2 {
      %c0_20 = arith.constant 0 : index
      %c0_21 = arith.constant 0 : index
      %32 = vector.load %arg2[%c0_20, %c0_21] : memref<16x128xf32, #tpu.memory_space<vmem>>, vector<16x128xf32>
      %33 = arith.mulf %32, %32 : vector<16x128xf32>
      %cst_22 = arith.constant dense<0.000000e+00> : vector<16xf32>
      %34 = vector.multi_reduction <add>, %33, %cst_22 [1] : vector<16x128xf32> to vector<16xf32>
      %35 = vector.shape_cast %34 : vector<16xf32> to vector<16x1xf32>
      %cst_23 = arith.constant 3.125000e-02 : f32
      %36 = vector.broadcast %cst_23 : f32 to vector<16x1xf32>
      %37 = arith.mulf %35, %36 : vector<16x1xf32>
      %cst_24 = arith.constant 9.99999974E-6 : f32
      %38 = vector.broadcast %cst_24 : f32 to vector<16x1xf32>
      %39 = arith.addf %37, %38 : vector<16x1xf32>
      %40 = math.rsqrt %39 : vector<16x1xf32>
      %41 = vector.broadcast %40 : vector<16x1xf32> to vector<16x128xf32>
      %42 = arith.mulf %32, %41 : vector<16x128xf32>
      %c0_25 = arith.constant 0 : index
      %c0_26 = arith.constant 0 : index
      %43 = vector.load %arg3[%c0_25, %c0_26] : memref<1x128xf32, #tpu.memory_space<vmem>>, vector<1x128xf32>
      %44 = vector.broadcast %43 : vector<1x128xf32> to vector<16x128xf32>
      %45 = arith.mulf %42, %44 : vector<16x128xf32>
      %46 = arith.truncf %45 : vector<16x128xf32> to vector<16x128xbf16>
      %c0_27 = arith.constant 0 : index
      %c0_28 = arith.constant 0 : index
      %47 = vector.load %arg9[%c0_27, %c0_28] : memref<16x128xbf16, #tpu.memory_space<vmem>>, vector<16x128xbf16>
      tpu.vector_store %arg9[%c0_27, %c0_28], %46 {strides = array<i32>} : memref<16x128xbf16, #tpu.memory_space<vmem>>, vector<16x128xbf16>,
      %cst_29 = arith.constant 0.000000e+00 : f32
      %48 = vector.broadcast %cst_29 : f32 to vector<16x128xf32>
      %c0_30 = arith.constant 0 : index
      %c0_31 = arith.constant 0 : index
      %49 = vector.load %arg10[%c0_30, %c0_31] : memref<16x128xf32, #tpu.memory_space<vmem>>, vector<16x128xf32>
      tpu.vector_store %arg10[%c0_30, %c0_31], %48 {strides = array<i32>} : memref<16x128xf32, #tpu.memory_space<vmem>>, vector<16x128xf32>,
    } else {
    }
    %c0 = arith.constant 0 : index
    %c0_1 = arith.constant 0 : index
    %3 = vector.load %arg9[%c0, %c0_1] : memref<16x128xbf16, #tpu.memory_space<vmem>>, vector<16x128xbf16>
    %c0_2 = arith.constant 0 : index
    %c0_3 = arith.constant 0 : index
    %4 = vector.load %arg4[%c0_2, %c0_3] : memref<128x128xbf16, #tpu.memory_space<vmem>>, vector<128x128xbf16>
    %cst = arith.constant dense<0.000000e+00> : vector<16x128xf32>
    %5 = tpu.matmul %3, %4, %cst {dimension_numbers = #tpu.dot_dimension_numbers<[1], [0], [0], [1], [0, 0, 1, 1], [], []>} : vector<16x128xbf16>, vector<128x128xbf16>, vector<16x128xf32> -> vector<16x128xf32>
    %c0_4 = arith.constant 0 : index
    %c0_5 = arith.constant 0 : index
    %6 = vector.load %arg5[%c0_4, %c0_5] : memref<128x128xbf16, #tpu.memory_space<vmem>>, vector<128x128xbf16>
    %cst_6 = arith.constant dense<0.000000e+00> : vector<16x128xf32>
    %7 = tpu.matmul %3, %6, %cst_6 {dimension_numbers = #tpu.dot_dimension_numbers<[1], [0], [0], [1], [0, 0, 1, 1], [], []>} : vector<16x128xbf16>, vector<128x128xbf16>, vector<16x128xf32> -> vector<16x128xf32>
    %cst_7 = arith.constant 2.000000e+01 : f32
    %8 = vector.broadcast %cst_7 : f32 to vector<16x128xf32>
    %9 = arith.minimumf %5, %8 : vector<16x128xf32>
    %10 = math.exp %9 : vector<16x128xf32>
    %cst_8 = arith.constant 2.000000e+00 : f32
    %11 = vector.broadcast %cst_8 : f32 to vector<16x128xf32>
    %12 = arith.addf %10, %11 : vector<16x128xf32>
    %13 = arith.mulf %10, %12 : vector<16x128xf32>
    %cst_9 = arith.constant 2.000000e+01 : f32
    %14 = vector.broadcast %cst_9 : f32 to vector<16x128xf32>
    %15 = arith.cmpf ogt, %5, %14 : vector<16x128xf32>
    %16 = arith.mulf %5, %13 : vector<16x128xf32>
    %cst_10 = arith.constant 2.000000e+00 : f32
    %17 = vector.broadcast %cst_10 : f32 to vector<16x128xf32>
    %18 = arith.addf %13, %17 : vector<16x128xf32>
    %19 = tpu.reciprocal %18 {approx = true} : vector<16x128xf32> -> vector<16x128xf32>
    %20 = arith.mulf %16, %19 : vector<16x128xf32>
    %21 = arith.select %15, %5, %20 : vector<16x128xi1>, vector<16x128xf32>
    %22 = arith.mulf %21, %7 : vector<16x128xf32>
    %c0_11 = arith.constant 0 : index
    %c0_12 = arith.constant 0 : index
    %23 = vector.load %arg10[%c0_11, %c0_12] : memref<16x128xf32, #tpu.memory_space<vmem>>, vector<16x128xf32>
    %24 = arith.truncf %22 : vector<16x128xf32> to vector<16x128xbf16>
    %c0_13 = arith.constant 0 : index
    %c0_14 = arith.constant 0 : index
    %25 = vector.load %arg6[%c0_13, %c0_14] : memref<128x128xbf16, #tpu.memory_space<vmem>>, vector<128x128xbf16>
    %cst_15 = arith.constant dense<0.000000e+00> : vector<16x128xf32>
    %26 = tpu.matmul %24, %25, %cst_15 {dimension_numbers = #tpu.dot_dimension_numbers<[1], [0], [0], [1], [0, 0, 1, 1], [], []>} : vector<16x128xbf16>, vector<128x128xbf16>, vector<16x128xf32> -> vector<16x128xf32>
    %27 = arith.addf %23, %26 : vector<16x128xf32>
    %c0_16 = arith.constant 0 : index
    %c0_17 = arith.constant 0 : index
    %28 = vector.load %arg10[%c0_16, %c0_17] : memref<16x128xf32, #tpu.memory_space<vmem>>, vector<16x128xf32>
    tpu.vector_store %arg10[%c0_16, %c0_17], %27 {strides = array<i32>} : memref<16x128xf32, #tpu.memory_space<vmem>>, vector<16x128xf32>,
    %c0_i32_18 = arith.constant 0 : i32
    %29 = arith.cmpi eq, %arg1, %c0_i32_18 : i32
    %30 = arith.extui %29 : i1 to i32
    %c0_i32_19 = arith.constant 0 : i32
    %31 = arith.cmpi ne, %30, %c0_i32_19 : i32
    scf.if %31 {
      %c0_20 = arith.constant 0 : index
      %c0_21 = arith.constant 0 : index
      %32 = vector.load %arg10[%c0_20, %c0_21] : memref<16x128xf32, #tpu.memory_space<vmem>>, vector<16x128xf32>
      %33 = arith.mulf %32, %32 : vector<16x128xf32>
      %cst_22 = arith.constant dense<0.000000e+00> : vector<16xf32>
      %34 = vector.multi_reduction <add>, %33, %cst_22 [1] : vector<16x128xf32> to vector<16xf32>
      %35 = vector.shape_cast %34 : vector<16xf32> to vector<16x1xf32>
      %cst_23 = arith.constant 3.125000e-02 : f32
      %36 = vector.broadcast %cst_23 : f32 to vector<16x1xf32>
      %37 = arith.mulf %35, %36 : vector<16x1xf32>
      %cst_24 = arith.constant 9.99999974E-6 : f32
      %38 = vector.broadcast %cst_24 : f32 to vector<16x1xf32>
      %39 = arith.addf %37, %38 : vector<16x1xf32>
      %40 = math.rsqrt %39 : vector<16x1xf32>
      %41 = vector.broadcast %40 : vector<16x1xf32> to vector<16x128xf32>
      %42 = arith.mulf %32, %41 : vector<16x128xf32>
      %c0_25 = arith.constant 0 : index
      %c0_26 = arith.constant 0 : index
      %43 = vector.load %arg7[%c0_25, %c0_26] : memref<1x128xf32, #tpu.memory_space<vmem>>, vector<1x128xf32>
      %44 = vector.broadcast %43 : vector<1x128xf32> to vector<16x128xf32>
      %45 = arith.mulf %42, %44 : vector<16x128xf32>
      %c0_27 = arith.constant 0 : index
      %c0_28 = arith.constant 0 : index
      %46 = vector.load %arg8[%c0_27, %c0_28] : memref<16x128xf32, #tpu.memory_space<vmem>>, vector<16x128xf32>
      tpu.vector_store %arg8[%c0_27, %c0_28], %45 {strides = array<i32>} : memref<16x128xf32, #tpu.memory_space<vmem>>, vector<16x128xf32>,
    } else {
    }
    return
  }
  func.func @transform_0(%arg0: i32, %arg1: i32) -> (i32, i32) {
    %c0_i32 = arith.constant 0 : i32
    %c0_i32_0 = arith.constant 0 : i32
    return %arg0, %c0_i32 : i32, i32
  }
  func.func @transform_1(%arg0: i32, %arg1: i32) -> (i32, i32) {
    %c0_i32 = arith.constant 0 : i32
    %c0_i32_0 = arith.constant 0 : i32
    %c0_i32_1 = arith.constant 0 : i32
    return %c0_i32, %c0_i32_0 : i32, i32
  }
  func.func @transform_2(%arg0: i32, %arg1: i32) -> (i32, i32) {
    %c0_i32 = arith.constant 0 : i32
    %c0_i32_0 = arith.constant 0 : i32
    return %c0_i32, %arg1 : i32, i32
  }
  func.func @transform_3(%arg0: i32, %arg1: i32) -> (i32, i32) {
    %c0_i32 = arith.constant 0 : i32
    %c0_i32_0 = arith.constant 0 : i32
    return %c0_i32, %arg1 : i32, i32
  }
  func.func @transform_4(%arg0: i32, %arg1: i32) -> (i32, i32) {
    %c0_i32 = arith.constant 0 : i32
    %c0_i32_0 = arith.constant 0 : i32
    return %arg1, %c0_i32 : i32, i32
  }
  func.func @transform_5(%arg0: i32, %arg1: i32) -> (i32, i32) {
    %c0_i32 = arith.constant 0 : i32
    %c0_i32_0 = arith.constant 0 : i32
    %c0_i32_1 = arith.constant 0 : i32
    return %c0_i32, %c0_i32_0 : i32, i32
  }
  func.func @transform_6(%arg0: i32, %arg1: i32) -> (i32, i32) {
    %c0_i32 = arith.constant 0 : i32
    %c0_i32_0 = arith.constant 0 : i32
    return %arg0, %c0_i32 : i32, i32
  }
}

</mosaic_0001>

<bundles_post_ra>
// kernel: tpu_custom_call.1
= control target key start
LH: loop header
LB: loop body
LE: loop exit
PB: predicated region body
PF: predicated region fallthrough
CT: control target
= control target key end

     0   :  { %11 = vsyncpa [#allocation5], 0  ;;  %s881_s0 = inlined_call_operand.hbm [shape: f32[16,128], index: 0, kind: input, shape index: {}]   ;;  %s882_s1 = inlined_call_operand.hbm [shape: f32[1,128], index: 1, kind: input, shape index: {}]   ;;  %s883_s2 = inlined_call_operand.hbm [shape: bf16[128,128], index: 2, kind: input, shape index: {}]   ;;  %s884_s3 = inlined_call_operand.hbm [shape: bf16[128,128], index: 3, kind: input, shape index: {}]   ;;  %s885_s4 = inlined_call_operand.hbm [shape: bf16[128,128], index: 4, kind: input, shape index: {}]   ;;  %s886_s5 = inlined_call_operand.vmem [shape: f32[1,128], index: 5, kind: input, shape index: {}]   ;;  %s887_s6 = inlined_call_operand.hbm [shape: f32[16,128], index: 6, kind: output, shape index: {}]  }
   0x1   :  { %12 = vsyncpa [#allocation8], 0 }
   0x2   :  { %13 = vsyncpa [#allocation11], 0  ;;  %s33_s23 = sshll.u32 %s882_s1, 4  ;;  %s34_s23 = int_to_ptr.hbm [resolvable:$true] %s33_s23 }
   0x3   :  { %14 = vsyncpa [#allocation6], 0  ;;  %s799_s24 = smov [#allocation7]   ;;  %s56_s28 = sshll.u32 %s884_s3, 4  ;;  %s57_s28 = int_to_ptr.hbm [resolvable:$true] %s56_s28 }
   0x4   :  { %s35_s25 = sshll.u32 %s799_s24, 4  ;;  %s800_s29 = smov [#allocation10]   ;;  %s36_s25 = int_to_ptr.vmem [resolvable:$true] %s35_s25 }
   0x5   :  { %38 = dma.hbm_to_vmem [thread:$0]  %s34_s23, 16, %s36_s25, [#allocation8]  }
   0x6   :  { %s58_s30 = sshll.u32 %s800_s29, 4  ;;  %s19_s9 = sshll.u32 %s881_s0, 4  ;;  %s59_s30 = int_to_ptr.vmem [resolvable:$true] %s58_s30  ;;  %s20_s9 = int_to_ptr.hbm [resolvable:$true] %s19_s9 }
   0x7   :  { %s801_s1 = smov 64   ;;  %s802_s10 = smov 4  }
   0x8   :  { %64 = dma.hbm_to_vmem [thread:$0]  %s57_s28, 1024, %s59_s30, [#allocation11], %s801_s1, %s801_s1, %s802_s10  }
   0x9   :  { %s803_s11 = smov [#allocation4]   ;;  %s43_s15 = sshll.u32 %s883_s2, 4  ;;  %s44_s15 = int_to_ptr.hbm [resolvable:$true] %s43_s15 }
   0xa   :  { %s21_s12 = sshll.u32 %s803_s11, 4  ;;  %s804_s3 = smov 128   ;;  %s22_s12 = int_to_ptr.vmem [resolvable:$true] %s21_s12 }
   0xb   :  { %s805_s16 = smov 8   ;;  %s806_s0 = smov [#allocation9]  }
   0xc   :  { %27 = dma.hbm_to_vmem [thread:$0]  %s20_s9, 256, %s22_s12, [#allocation5], %s804_s3, %s804_s3, %s805_s16  }
   0xd   :  { %s45_s17 = sshll.u32 %s806_s0, 4  ;;  %s69_s20 = sshll.u32 %s885_s4, 4  ;;  %s46_s17 = int_to_ptr.vmem [resolvable:$true] %s45_s17  ;;  %s70_s20 = int_to_ptr.hbm [resolvable:$true] %s69_s20 }
   0xe   :  { %51 = dma.hbm_to_vmem [thread:$0]  %s44_s15, 1024, %s46_s17, [#allocation8], %s801_s1, %s801_s1, %s802_s10  }
   0xf   :  { %s807_s21 = smov [#allocation12]  }
  0x10   :  { %s71_s22 = sshll.u32 %s807_s21, 4  ;;  %s72_s22 = int_to_ptr.vmem [resolvable:$true] %s71_s22 }
  0x11   :  { %77 = dma.hbm_to_vmem [thread:$0]  %s70_s20, 1024, %s72_s22, [#allocation11], %s801_s1, %s801_s1, %s802_s10  }
  0x12   :  { %791 = dma.done.wait [#allocation5], 256  }
  0x13   :  { %792 = vsyncadd [#allocation5], 4294967040 }
  0x14   :  { %793 = dma.done.wait [#allocation8], 1040  }
  0x15   :  { %794 = vsyncadd [#allocation8], 4294966256 }
  0x16   :  { %795 = dma.done.wait [#allocation11], 2048  }
  0x17   :  { %796 = vsyncadd [#allocation11], 4294965248  ;;  %v862_v0 = vld [vmem:[#allocation4] sm:$0xff]  ;;  %v866_v2 = vld [vmem:[#allocation4 + $0x8] sm:$0xff]  ;;  %s808_s23 = smov [#allocation13]   ;;  %s474_s27 = sshll.u32 %s887_s6, 4  ;;  %s475_s27 = int_to_ptr.hbm [resolvable:$true] %s474_s27 }
  0x18   :  { %v106_v1 = vmul.f32 %v862_v0, %v862_v0  ;;  %v107_v3 = vmul.f32 %v866_v2, %v866_v2  ;;  %v597_v4 = vld [vmem:[#allocation9 + $0x38] sm:$0xff]  ;;  %v596_v6 = vld [vmem:[#allocation9 + $0x30] sm:$0xff]  ;;  %v595_v8 = vld [vmem:[#allocation9 + $0x28] sm:$0xff]  ;;  %s472_s24 = sshll.u32 %s808_s23, 4  ;;  %s473_s24 = int_to_ptr.vmem [resolvable:$true] %s472_s24 }
  0x19   :  { %v605_v5 = vld [vmem:[#allocation10 + $0x38] sm:$0xff]  ;;  %222 = vmatpush.bf16.msra.mxu0 %v597_v4  ;;  %v604_v7 = vld [vmem:[#allocation10 + $0x30] sm:$0xff]  ;;  %v603_v9 = vld [vmem:[#allocation10 + $0x28] sm:$0xff] }
  0x1a   :  { %108 = vadd.xlane.f32.xlu0 %v106_v1  ;;  %300 = vmatpush.bf16.msra.mxu1 %v605_v5  ;;  %v594_v10 = vld [vmem:[#allocation9 + $0x20] sm:$0xff]  ;;  %v593_v12 = vld [vmem:[#allocation9 + $0x18] sm:$0xff]  ;;  %v592_v16 = vld [vmem:[#allocation9 + $0x10] sm:$0xff] }
  0x1b   :  { %v602_v11 = vld [vmem:[#allocation10 + $0x20] sm:$0xff]  ;;  %v601_v13 = vld [vmem:[#allocation10 + $0x18] sm:$0xff]  ;;  %v600_v17 = vld [vmem:[#allocation10 + $0x10] sm:$0xff] }
  0x1c   :  { %v591_v19 = vld [vmem:[#allocation9 + $0x8] sm:$0xff]  ;;  %v590_v21 = vld [vmem:[#allocation9] sm:$0xff]  ;;  %v629_v39 = vld [vmem:[#allocation7] ss:$0 sm:$0xff] }
  0x1d   :  { %223 = vmatpush.bf16.msra.mxu0 %v596_v6  ;;  %v599_v20 = vld [vmem:[#allocation10 + $0x8] sm:$0xff]  ;;  %v598_v22 = vld [vmem:[#allocation10] sm:$0xff]  ;;  %v613_v47 = vld [vmem:[#allocation12 + $0x38] sm:$0xff] }
  0x1e   :  { %301 = vmatpush.bf16.msra.mxu1 %v604_v7  ;;  %405 = vmatpush.bf16.msra.mxu2 %v613_v47  ;;  %v612_v48 = vld [vmem:[#allocation12 + $0x30] sm:$0xff]  ;;  %v611_v49 = vld [vmem:[#allocation12 + $0x28] sm:$0xff]  ;;  %v610_v50 = vld [vmem:[#allocation12 + $0x20] sm:$0xff] }
  0x1f   :  { %v609_v51 = vld [vmem:[#allocation12 + $0x18] sm:$0xff]  ;;  %v608_v52 = vld [vmem:[#allocation12 + $0x10] sm:$0xff]  ;;  %v607_v53 = vld [vmem:[#allocation12 + $0x8] sm:$0xff] }
  0x20   :  { %v606_v57 = vld [vmem:[#allocation12] sm:$0xff] }
  0x21   :  { %224 = vmatpush.bf16.msra.mxu0 %v595_v8 }
  0x22   :  { %110 = vadd.xlane.f32.xlu0 %v107_v3  ;;  %302 = vmatpush.bf16.msra.mxu1 %v603_v9 }
  0x23   :  { %406 = vmatpush.bf16.msra.mxu2 %v612_v48 }
  0x25   :  { %225 = vmatpush.bf16.msra.mxu0 %v594_v10 }
  0x26   :  { %303 = vmatpush.bf16.msra.mxu1 %v602_v11 }
  0x27   :  { %407 = vmatpush.bf16.msra.mxu2 %v611_v49 }
  0x29   :  { %226 = vmatpush.bf16.msra.mxu0 %v593_v12 }
  0x2a   :  { %304 = vmatpush.bf16.msra.mxu1 %v601_v13 }
  0x2b   :  { %408 = vmatpush.bf16.msra.mxu2 %v610_v50 }
  0x2d   :  { %227 = vmatpush.bf16.msra.mxu0 %v592_v16 }
  0x2e   :  { %305 = vmatpush.bf16.msra.mxu1 %v600_v17 }
  0x2f   :  { %409 = vmatpush.bf16.msra.mxu2 %v609_v51 }
  0x31   :  { %228 = vmatpush.bf16.msra.mxu0 %v591_v19 }
  0x32   :  { %306 = vmatpush.bf16.msra.mxu1 %v599_v20 }
  0x33   :  { %410 = vmatpush.bf16.msra.mxu2 %v608_v52 }
  0x35   :  { %229 = vmatpush.bf16.msra.mxu0 %v590_v21 }
  0x36   :  { %307 = vmatpush.bf16.msra.mxu1 %v598_v22 }
  0x37   :  { %411 = vmatpush.bf16.msra.mxu2 %v607_v53 }
  0x3b   :  { %412 = vmatpush.bf16.msra.mxu2 %v606_v57 }
  0x8d   :  { %v109_v14 = vpop.xlane.xlu0 %108 }
  0x8e   :  { %v112_v15 = vmul.f32 0.03125, %v109_v14 }
  0x90   :  { %v114_v18 = vadd.f32 1e-05, %v112_v15 }
  0x92   :  { %631 = vrsqrt.f32 %v114_v18  ;;  %vm122_vm1 = vweird.f32 %v114_v18 }
  0x95   :  { %v111_v23 = vpop.xlane.xlu0 %110 }
  0x96   :  { %v113_v24 = vmul.f32 0.03125, %v111_v23 }
  0x98   :  { %v632_v25 = vpop.eup %631  ;;  %v115_v26 = vadd.f32 1e-05, %v113_v24 }
  0x99   :  { %v117_v27 = vmul.f32 %v632_v25, %v114_v18  ;;  %vm123_vm0 = vweird.f32 %v632_v25 }
  0x9a   :  { %633 = vrsqrt.f32 %v115_v26  ;;  %vm124_vm2 = vmor %vm122_vm1, %vm123_vm0  ;;  %vm132_vm4 = vweird.f32 %v115_v26 }
  0x9b   :  { %v118_v28 = vmul.f32 %v632_v25, %v117_v27 }
  0x9d   :  { %v119_v29 = vmul.f32 0.5, %v118_v28 }
  0x9f   :  { %v120_v30 = vsub.f32 1.5, %v119_v29 }
  0xa0   :  { %v634_v31 = vpop.eup %633 }
  0xa1   :  { %v127_v32 = vmul.f32 %v634_v31, %v115_v26  ;;  %v121_v33 = vmul.f32 %v632_v25, %v120_v30  ;;  %vm133_vm3 = vweird.f32 %v634_v31 }
  0xa2   :  { %vm134_vm5 = vmor %vm132_vm4, %vm133_vm3 }
  0xa3   :  { %v128_v34 = vmul.f32 %v634_v31, %v127_v32  ;;  %v125_v36 = vsel %vm124_vm2, %v632_v25, %v121_v33 }
  0xa4   :  { %v136_v40 = vmul.f32 %v125_v36, %v862_v0  ;;  %v630_v36 = vld [vmem:[%s886_s5] ss:$0 sm:$0xff] }
  0xa5   :  { %v129_v35 = vmul.f32 0.5, %v128_v34 }
  0xa6   :  { %v142_v43 = vmul.f32 %v629_v39, %v136_v40 }
  0xa7   :  { %v130_v37 = vsub.f32 1.5, %v129_v35 }
  0xa9   :  { %v131_v38 = vmul.f32 %v634_v31, %v130_v37 }
  0xab   :  { %v135_v41 = vsel %vm134_vm5, %v634_v31, %v131_v38 }
  0xac   :  { %v137_v42 = vmul.f32 %v135_v41, %v866_v2 }
  0xae   :  { %v143_v44 = vmul.f32 %v629_v39, %v137_v42 }
  0xb0   :  { %v617_v45 = vpack.c.bf16 %v143_v44, %v142_v43 }
  0xb2   :  { %618 = vst [vmem:[#allocation2] sm:$0xff] %v617_v45  }
  0xb9   :  { %v589_v46 = vld [vmem:[#allocation2] sm:$0xff] }
  0xba   :  { %230 = vmatmul.bf16.vlgmr.msra.gmra.mxu0 %v589_v46  ;;  %308 = vmatmul.bf16.vlgmr.msra.gmra.mxu1 %v589_v46 }
 0x137   :  { %v231_v54 = vpop.f32.mrf.mxu0  ;;  %v309_v5 = vpop.f32.mrf.mxu1 }
 0x138   :  { %v314_v55 = vmin.f32 %v231_v54, 20.0  ;;  %vm324_vm6 = vcmp.gt.f32.partialorder %v231_v54, 20.0 }
 0x13a   :  { %v316_v56 = vmul.f32 1.442695, %v314_v55 }
 0x13c   :  { %635 = vpow2.f32 %v316_v56 }
 0x13f   :  { %v233_v58 = vpop.f32.mrf.mxu0  ;;  %v311_v13 = vpop.f32.mrf.mxu1 }
 0x140   :  { %v315_v59 = vmin.f32 %v233_v58, 20.0  ;;  %vm325_vm7 = vcmp.gt.f32.partialorder %v233_v58, 20.0 }
 0x142   :  { %v636_v60 = vpop.eup %635  ;;  %v318_v61 = vmul.f32 1.442695, %v315_v59 }
 0x143   :  { %v320_v62 = vadd.f32 2.0, %v636_v60 }
 0x144   :  { %637 = vpow2.f32 %v318_v61 }
 0x145   :  { %v322_v63 = vmul.f32 %v636_v60, %v320_v62 }
 0x147   :  { %v328_v0 = vadd.f32 2.0, %v322_v63  ;;  %v326_v7 = vmul.f32 %v322_v63, %v231_v54 }
 0x149   :  { %639 = vrcp.f32 %v328_v0 }
 0x14a   :  { %v638_v1 = vpop.eup %637 }
 0x14b   :  { %v321_v2 = vadd.f32 2.0, %v638_v1 }
 0x14d   :  { %v323_v3 = vmul.f32 %v638_v1, %v321_v2 }
 0x14f   :  { %v329_v4 = vadd.f32 2.0, %v323_v3  ;;  %v640_v6 = vpop.eup %639  ;;  %v327_v9 = vmul.f32 %v323_v3, %v233_v58 }
 0x150   :  { %v332_v8 = vmul.f32 %v640_v6, %v326_v7 }
 0x151   :  { %641 = vrcp.f32 %v329_v4 }
 0x152   :  { %v334_v11 = vsel %vm324_vm6, %v231_v54, %v332_v8 }
 0x153   :  { %v336_v15 = vmul.f32 %v334_v11, %v309_v5 }
 0x157   :  { %v642_v10 = vpop.eup %641 }
 0x158   :  { %v333_v12 = vmul.f32 %v642_v10, %v327_v9 }
 0x15a   :  { %v335_v14 = vsel %vm325_vm7, %v233_v58, %v333_v12 }
 0x15b   :  { %v337_v16 = vmul.f32 %v335_v14, %v311_v13 }
 0x15d   :  { %v340_v17 = vpack.c.bf16 %v337_v16, %v336_v15 }
 0x15f   :  { %413 = vmatmul.bf16.vlgmr.msra.gmra.mxu2 %v340_v17 }
 0x1e2   :  { %v414_v18 = vpop.f32.mrf.mxu2 }
 0x1e3   :  { %v428_v19 = vmul.f32 %v414_v18, %v414_v18 }
 0x1e5   :  { %430 = vadd.xlane.f32.xlu1 %v428_v19 }
 0x1ea   :  { %v416_v20 = vpop.f32.mrf.mxu2 }
 0x1eb   :  { %v429_v21 = vmul.f32 %v416_v20, %v416_v20 }
 0x1ed   :  { %432 = vadd.xlane.f32.xlu1 %v429_v21 }
 0x258   :  { %v431_v22 = vpop.xlane.xlu1 %430 }
 0x259   :  { %v434_v23 = vmul.f32 0.03125, %v431_v22 }
 0x25b   :  { %v436_v24 = vadd.f32 1e-05, %v434_v23 }
 0x25d   :  { %643 = vrsqrt.f32 %v436_v24  ;;  %vm444_vm9 = vweird.f32 %v436_v24 }
 0x260   :  { %v433_v25 = vpop.xlane.xlu1 %432 }
 0x261   :  { %v435_v26 = vmul.f32 0.03125, %v433_v25 }
 0x263   :  { %v644_v27 = vpop.eup %643  ;;  %v437_v28 = vadd.f32 1e-05, %v435_v26 }
 0x264   :  { %v439_v29 = vmul.f32 %v644_v27, %v436_v24  ;;  %vm445_vm8 = vweird.f32 %v644_v27 }
 0x265   :  { %645 = vrsqrt.f32 %v437_v28  ;;  %vm446_vm10 = vmor %vm444_vm9, %vm445_vm8  ;;  %vm454_vm12 = vweird.f32 %v437_v28 }
 0x266   :  { %v440_v30 = vmul.f32 %v644_v27, %v439_v29 }
 0x268   :  { %v441_v31 = vmul.f32 0.5, %v440_v30 }
 0x26a   :  { %v442_v32 = vsub.f32 1.5, %v441_v31 }
 0x26b   :  { %v646_v33 = vpop.eup %645 }
 0x26c   :  { %v443_v34 = vmul.f32 %v644_v27, %v442_v32  ;;  %v449_v35 = vmul.f32 %v646_v33, %v437_v28  ;;  %vm455_vm11 = vweird.f32 %v646_v33 }
 0x26d   :  { %vm456_vm13 = vmor %vm454_vm12, %vm455_vm11 }
 0x26e   :  { %v447_v37 = vsel %vm446_vm10, %v644_v27, %v443_v34  ;;  %v450_v38 = vmul.f32 %v646_v33, %v449_v35 }
 0x26f   :  { %v458_v39 = vmul.f32 %v447_v37, %v414_v18 }
 0x270   :  { %v451_v40 = vmul.f32 0.5, %v450_v38 }
 0x271   :  { %v464_v41 = vmul.f32 %v630_v36, %v458_v39 }
 0x272   :  { %v452_v42 = vsub.f32 1.5, %v451_v40 }
 0x273   :  { %466 = vst [vmem:[#allocation13] sm:$0xff] %v464_v41 }
 0x274   :  { %v453_v43 = vmul.f32 %v646_v33, %v452_v42 }
 0x276   :  { %v457_v44 = vsel %vm456_vm13, %v646_v33, %v453_v43 }
 0x277   :  { %v459_v45 = vmul.f32 %v457_v44, %v416_v20 }
 0x279   :  { %v465_v46 = vmul.f32 %v630_v36, %v459_v45 }
 0x27b   :  { %467 = vst [vmem:[#allocation13 + $0x8] sm:$0xff] %v465_v46 }
 0x27c   :  { %480 = dma.vmem_to_hbm [thread:$0]  %s473_s24, 256, %s475_s27, [#allocation6], %s804_s3, %s804_s3, %s805_s16  }
 0x27d   :  { %797 = dma.done.wait [#allocation6], 256  }
 0x27e   :  { %798 = vsyncadd [#allocation6], 4294967040 }
 0x27f   :  { %485 = vsyncpa [#allocation5], 1 }
 0x280   :  { %486 = vsyncpa [#allocation8], 1 }
 0x281   :  { %487 = vsyncpa [#allocation11], 1 }
 0x282   :  { %488 = vsyncpa [#allocation6], 1 }

</bundles_post_ra>
